<compile_context>
chip_gen: v7x
topology: tpu7x:2x2x1
jax: 0.10.0
libtpu: 0.0.40
codegen_flags: <defaults>
</compile_context>

<pallas_src>
import functools
import math

import jax
import jax.numpy as jnp
from jax.experimental import pallas as pl
from jax.experimental.pallas import tpu as pltpu


def _round_up(v: int, m: int) -> int:
    return ((v + m - 1) // m) * m


def _memory_unit_kernel(x_ref, w_ref, out_ref, att_ref, *,
                        shrink_thres, eps, mem_dim, compute_dtype):
    x = x_ref[...]          # (TN, Dp)   native dtype
    w = w_ref[...]          # (Mp, Dp)   native dtype (resident, single buffer)

    if compute_dtype is not None:
        x = x.astype(compute_dtype)
        w = w.astype(compute_dtype)

    # logits = x @ W.T : contract last dims of both operands (no transpose).
    logits = jax.lax.dot_general(
        x, w, dimension_numbers=(((1,), (1,)), ((), ())),
        preferred_element_type=jnp.float32,
    )                        # (TN, Mp) f32

    mem_pad = att_ref.shape[-1]
    if mem_pad != mem_dim:
        # Padded memory slots must not participate in the softmax.
        col = jax.lax.broadcasted_iota(jnp.int32, logits.shape, 1)
        logits = jnp.where(col < mem_dim, logits, jnp.float32(-1e30))

    # Softmax over the memory dimension, f32, with fused hard-shrink.
    m = jnp.max(logits, axis=1, keepdims=True)
    e = jnp.exp(logits - m)
    s = jnp.sum(e, axis=1, keepdims=True)

    if shrink_thres > 0.0:
        # att = e/s ; keep(att > lambda)  <=>  e > lambda*s.  The softmax
        # denominator cancels in the subsequent L1 normalization, so the
        # shrunk e is renormalized directly (one pass, one divide).
        # Differs from PyTorch's relu(a-l)*a/(|a-l|+eps) only in an O(eps)
        # band around the threshold.
        e = jnp.where(e > shrink_thres * s, e, 0.0)
        s = jnp.sum(e, axis=1, keepdims=True)

    # Exact divide for the final (returned) normalization.
    att = e / jnp.maximum(s, eps)

    # out = att @ W : (TN, Dp), f32 accumulation on the MXU.
    out = jax.lax.dot_general(
        att.astype(w.dtype), w, dimension_numbers=(((1,), (0,)), ((), ())),
        preferred_element_type=jnp.float32,
    )

    out_ref[...] = out.astype(out_ref.dtype)
    att_ref[...] = att.astype(att_ref.dtype)


def memory_unit_forward(x, weight, shrink_thres=0.0025, *,
                        block_rows=512, att_dtype=None,
                        cast_matmul_to_bf16=False):
    """x: (N, latent_dim); weight: (mem_dim, latent_dim)."""
    n, d = x.shape
    mem_dim, d_w = weight.shape
    assert d == d_w

    # att is returned; keep the input dtype unless the caller opts into bf16.
    att_dtype = x.dtype if att_dtype is None else jnp.dtype(att_dtype)
    compute_dtype = (jnp.bfloat16
                     if (cast_matmul_to_bf16 and jnp.dtype(x.dtype) == jnp.float32)
                     else None)

    # Lane-dense padding (exact: zero columns/rows contribute nothing and the
    # padded memory columns are masked out of the softmax inside the kernel).
    d_pad = _round_up(max(d, 128), 128)
    mem_pad = _round_up(max(mem_dim, 128), 128)

    # Balanced row tiles: choose grid_rows first, then split n evenly so
    # padding is < 8 rows per tile. Force >= 2 tiles for moderate batches so
    # the "parallel" axis can shard across v7x's 2 TensorCores.
    grid_rows = pl.cdiv(n, block_rows)
    if grid_rows == 1 and n > 64:
        grid_rows = 2
    tn = _round_up(pl.cdiv(n, grid_rows), 8)
    n_pad = grid_rows * tn

    # Skip padding copies when shapes are already aligned.
    x_p = x if (n_pad == n and d_pad == d) else jnp.pad(
        x, ((0, n_pad - n), (0, d_pad - d)))
    w_p = weight if (mem_pad == mem_dim and d_pad == d) else jnp.pad(
        weight, ((0, mem_pad - mem_dim), (0, d_pad - d)))

    # VMEM budget with real dtype sizes: single-buffered resident weight,
    # double-buffered x/out/att row tiles, plus f32 elementwise temporaries
    # over the (TN, Mp) attention tile.
    isz = lambda dt: jnp.dtype(dt).itemsize
    vmem_est = (mem_pad * d_pad * isz(weight.dtype)            # weight (1 buf)
                + 2 * tn * d_pad * isz(x.dtype)                # x tiles
                + 2 * tn * d_pad * isz(x.dtype)                # out tiles
                + 2 * tn * mem_pad * isz(att_dtype)            # att tiles
                + 6 * tn * mem_pad * 4)                        # f32 temporaries
    try:
        phys_vmem = int(pltpu.get_tpu_info().vmem_capacity_bytes)
    except Exception:
        phys_vmem = 64 * 2**20  # conservative (v7x per-TC) fallback
    vmem_cap = int(0.6 * phys_vmem)  # ~38 MiB on v7x, ~76 MiB on v5e/v6e
    vmem_limit = int(min(max(2 * vmem_est, 16 * 2**20), vmem_cap))

    cost = pl.CostEstimate(
        flops=4 * n_pad * mem_pad * d_pad,                     # two matmuls
        transcendentals=n_pad * mem_pad,                       # exp
        bytes_accessed=(n_pad * d_pad * isz(x.dtype)           # x read
                        + mem_pad * d_pad * isz(weight.dtype)  # W read
                        + n_pad * d_pad * isz(x.dtype)         # out write
                        + n_pad * mem_pad * isz(att_dtype)),   # att write
    )

    kernel = functools.partial(
        _memory_unit_kernel,
        shrink_thres=float(shrink_thres), eps=1e-12,
        mem_dim=mem_dim, compute_dtype=compute_dtype,
    )

    out_p, att_p = pl.pallas_call(
        kernel,
        out_shape=(
            jax.ShapeDtypeStruct((n_pad, d_pad), x.dtype),
            jax.ShapeDtypeStruct((n_pad, mem_pad), att_dtype),
        ),
        grid_spec=pltpu.PrefetchScalarGridSpec(
            num_scalar_prefetch=0,
            grid=(grid_rows,),
            in_specs=[
                pl.BlockSpec((tn, d_pad), lambda i: (i, 0)),       # x row tile
                pl.BlockSpec((mem_pad, d_pad), lambda i: (0, 0),   # resident W
                             pipeline_mode=pl.Buffered(1)),
            ],
            out_specs=[
                pl.BlockSpec((tn, d_pad), lambda i: (i, 0)),       # out row tile
                pl.BlockSpec((tn, mem_pad), lambda i: (i, 0)),     # att row tile
            ],
        ),
        compiler_params=pltpu.CompilerParams(
            dimension_semantics=("parallel",),
            vmem_limit_bytes=vmem_limit,
        ),
        cost_estimate=cost,
    )(x_p, w_p)

    out = out_p if (n_pad == n and d_pad == d) else out_p[:n, :d]
    att = att_p if (n_pad == n and mem_pad == mem_dim) else att_p[:n, :mem_dim]
    return {"output": out, "att": att}


def _reference(x, weight, shrink_thres=0.0025):
    """Pure-JAX reference mirroring the PyTorch module exactly."""
    att = x @ weight.T
    att = jax.nn.softmax(att, axis=1)
    if shrink_thres > 0:
        shifted = att - shrink_thres
        att = jnp.maximum(shifted, 0.0) * att / (jnp.abs(shifted) + 1e-12)
        att = att / jnp.maximum(jnp.sum(jnp.abs(att), axis=1, keepdims=True), 1e-12)
    out = att @ weight
    return {"output": out, "att": att}


if __name__ == "__main__":
    # Shapes implied by the module: input (batch, latent_dim), weight (mem_dim, latent_dim).
    # mem_dim=100 deliberately exercises the mem_dim->128 padding + in-kernel mask path.
    batch, latent_dim, mem_dim = 8, 32, 100
    shrink_thres = 0.0025

    key = jax.random.PRNGKey(0)
    kx, kw = jax.random.split(key)

    x = jax.random.normal(kx, (batch, latent_dim), dtype=jnp.float32)

    # Deterministic init matching reset_parameters(): uniform(-stdv, stdv), stdv = 1/sqrt(latent_dim)
    stdv = 1.0 / math.sqrt(latent_dim)
    weight = jax.random.uniform(
        kw, (mem_dim, latent_dim), dtype=jnp.float32, minval=-stdv, maxval=stdv
    )

    result = memory_unit_forward(x, weight, shrink_thres)
    jax.block_until_ready(result)

    ref = _reference(x, weight, shrink_thres)
    assert result["output"].shape == (batch, latent_dim)
    assert result["att"].shape == (batch, mem_dim)
    # Tolerance covers the where-based hard-shrink rewrite (O(1e-12) band) and
    # MXU vs XLA f32 matmul rounding.
    assert jnp.allclose(result["output"], ref["output"], atol=1e-4, rtol=1e-3)
    assert jnp.allclose(result["att"], ref["att"], atol=1e-4, rtol=1e-3)

    print("KERNEL_OK")
</pallas_src>

<mosaic_0001>
module attributes {stable_mosaic.version = 11 : i64} {
  func.func @_memory_unit_kernel(%arg0: i32, %arg1: memref<8x128xf32, #tpu.memory_space<vmem>>, %arg2: memref<128x128xf32, #tpu.memory_space<vmem>>, %arg3: memref<8x128xf32, #tpu.memory_space<vmem>>, %arg4: memref<8x128xf32, #tpu.memory_space<vmem>>) attributes {dimension_semantics = [#tpu.dimension_semantics<parallel>], iteration_bounds = array<i64: 1>, scalar_prefetch = 0 : i64, scratch_operands = 0 : i64, tpu.core_type = #tpu.core_type<tc>, window_params = [{transform_indices = @transform_0, window_bounds = array<i64: 8, 128>}, {pipeline_mode = #tpu.pipeline_mode<synchronous>, transform_indices = @transform_1, window_bounds = array<i64: 128, 128>}, {transform_indices = @transform_2, window_bounds = array<i64: 8, 128>}, {transform_indices = @transform_3, window_bounds = array<i64: 8, 128>}]} {
    %c0 = arith.constant 0 : index
    %c0_0 = arith.constant 0 : index
    %0 = vector.load %arg1[%c0, %c0_0] : memref<8x128xf32, #tpu.memory_space<vmem>>, vector<8x128xf32>
    %c0_1 = arith.constant 0 : index
    %c0_2 = arith.constant 0 : index
    %1 = vector.load %arg2[%c0_1, %c0_2] : memref<128x128xf32, #tpu.memory_space<vmem>>, vector<128x128xf32>
    %cst = arith.constant dense<0.000000e+00> : vector<8x128xf32>
    %2 = tpu.matmul %0, %1, %cst {dimension_numbers = #tpu.dot_dimension_numbers<[1], [1], [0], [0], [0, 0, 1, 0], [], []>} : vector<8x128xf32>, vector<128x128xf32>, vector<8x128xf32> -> vector<8x128xf32>
    %3 = tpu.iota {dimensions = array<i32: 1>} : vector<8x128xi32>
    %c100_i32 = arith.constant 100 : i32
    %4 = vector.broadcast %c100_i32 : i32 to vector<8x128xi32>
    %5 = arith.cmpi slt, %3, %4 : vector<8x128xi32>
    %cst_3 = arith.constant -1.000000e+30 : f32
    %6 = vector.broadcast %cst_3 : f32 to vector<8x128xf32>
    %7 = arith.select %5, %2, %6 : vector<8x128xi1>, vector<8x128xf32>
    %cst_4 = arith.constant dense<0xFF800000> : vector<8xf32>
    %8 = vector.multi_reduction <maximumf>, %7, %cst_4 [1] : vector<8x128xf32> to vector<8xf32>
    %9 = vector.shape_cast %8 : vector<8xf32> to vector<8x1xf32>
    %10 = vector.broadcast %9 : vector<8x1xf32> to vector<8x128xf32>
    %11 = arith.subf %7, %10 : vector<8x128xf32>
    %12 = math.exp %11 : vector<8x128xf32>
    %cst_5 = arith.constant dense<0.000000e+00> : vector<8xf32>
    %13 = vector.multi_reduction <add>, %12, %cst_5 [1] : vector<8x128xf32> to vector<8xf32>
    %14 = vector.shape_cast %13 : vector<8xf32> to vector<8x1xf32>
    %cst_6 = arith.constant 2.500000e-03 : f32
    %15 = vector.broadcast %cst_6 : f32 to vector<8x1xf32>
    %16 = arith.mulf %15, %14 : vector<8x1xf32>
    %17 = vector.broadcast %16 : vector<8x1xf32> to vector<8x128xf32>
    %18 = arith.cmpf ogt, %12, %17 : vector<8x128xf32>
    %cst_7 = arith.constant 0.000000e+00 : f32
    %19 = vector.broadcast %cst_7 : f32 to vector<8x128xf32>
    %20 = arith.select %18, %12, %19 : vector<8x128xi1>, vector<8x128xf32>
    %cst_8 = arith.constant dense<0.000000e+00> : vector<8xf32>
    %21 = vector.multi_reduction <add>, %20, %cst_8 [1] : vector<8x128xf32> to vector<8xf32>
    %22 = vector.shape_cast %21 : vector<8xf32> to vector<8x1xf32>
    %cst_9 = arith.constant 9.99999996E-13 : f32
    %23 = vector.broadcast %cst_9 : f32 to vector<8x1xf32>
    %24 = arith.maximumf %22, %23 : vector<8x1xf32>
    %25 = vector.broadcast %24 : vector<8x1xf32> to vector<8x128xf32>
    %26 = arith.divf %20, %25 : vector<8x128xf32>
    %cst_10 = arith.constant dense<0.000000e+00> : vector<8x128xf32>
    %27 = tpu.matmul %26, %1, %cst_10 {dimension_numbers = #tpu.dot_dimension_numbers<[1], [0], [0], [1], [0, 0, 1, 1], [], []>} : vector<8x128xf32>, vector<128x128xf32>, vector<8x128xf32> -> vector<8x128xf32>
    %c0_11 = arith.constant 0 : index
    %c0_12 = arith.constant 0 : index
    %28 = vector.load %arg3[%c0_11, %c0_12] : memref<8x128xf32, #tpu.memory_space<vmem>>, vector<8x128xf32>
    tpu.vector_store %arg3[%c0_11, %c0_12], %27 {strides = array<i32>} : memref<8x128xf32, #tpu.memory_space<vmem>>, vector<8x128xf32>,
    %c0_13 = arith.constant 0 : index
    %c0_14 = arith.constant 0 : index
    %29 = vector.load %arg4[%c0_13, %c0_14] : memref<8x128xf32, #tpu.memory_space<vmem>>, vector<8x128xf32>
    tpu.vector_store %arg4[%c0_13, %c0_14], %26 {strides = array<i32>} : memref<8x128xf32, #tpu.memory_space<vmem>>, vector<8x128xf32>,
    return
  }
  func.func @transform_0(%arg0: i32) -> (i32, i32) {
    %c0_i32 = arith.constant 0 : i32
    %c0_i32_0 = arith.constant 0 : i32
    return %arg0, %c0_i32 : i32, i32
  }
  func.func @transform_1(%arg0: i32) -> (i32, i32) {
    %c0_i32 = arith.constant 0 : i32
    %c0_i32_0 = arith.constant 0 : i32
    %c0_i32_1 = arith.constant 0 : i32
    return %c0_i32, %c0_i32_0 : i32, i32
  }
  func.func @transform_2(%arg0: i32) -> (i32, i32) {
    %c0_i32 = arith.constant 0 : i32
    %c0_i32_0 = arith.constant 0 : i32
    return %arg0, %c0_i32 : i32, i32
  }
  func.func @transform_3(%arg0: i32) -> (i32, i32) {
    %c0_i32 = arith.constant 0 : i32
    %c0_i32_0 = arith.constant 0 : i32
    return %arg0, %c0_i32 : i32, i32
  }
}

</mosaic_0001>

<bundles_post_ra>
// kernel: tpu_custom_call.1
= control target key start
LH: loop header
LB: loop body
LE: loop exit
PB: predicated region body
PF: predicated region fallthrough
CT: control target
= control target key end

     0   :  { %9 = vsyncpa [#allocation3], 0  ;;  %s594_s0 = inlined_call_operand.hbm [shape: f32[8,128], index: 0, kind: input, shape index: {}]   ;;  %s595_s1 = inlined_call_operand.hbm [shape: f32[128,128], index: 1, kind: input, shape index: {}]   ;;  %s596_s2 = inlined_call_operand.hbm [shape: f32[8,128], index: 2, kind: output, shape index: {0}]   ;;  %s597_s3 = inlined_call_operand.hbm [shape: f32[8,128], index: 3, kind: output, shape index: {1}]  }
   0x1   :  { %10 = vsyncpa [#allocation6], 0 }
   0x2   :  { %11 = vsyncpa [#allocation4], 0 }
   0x3   :  { %12 = vsyncpa [#allocation9], 0  ;;  %s510_s12 = smov [#allocation2]   ;;  %s511_s14 = smov [#allocation5]  }
   0x4   :  { %s19_s13 = sshll.u32 %s510_s12, 4  ;;  %s28_s15 = sshll.u32 %s511_s14, 4  ;;  %s20_s13 = int_to_ptr.vmem [resolvable:$true] %s19_s13  ;;  %s539_s15 = int_to_ptr.vmem [resolvable:$true] %s28_s15 }
   0x5   :  { %s414_s18 = scalar_lea.hbm %s594_s0, 128 }
   0x6   :  { %p415_p0 = scmp.ne.s32.totalorder %s594_s0, %s414_s18  ;;  %p418_p1 = scmp.lt.u32.totalorder %s414_s18, %s594_s0 }
   0x8   :  { %p420_p2 = pnand %p418_p1, %p415_p0 }
   0xa   :  { %423 = shalt.err (!%p420_p2)
}
   0xb   :  { %s424_s23 = scalar_lea.vmem %s20_s13, 128  ;;  %p429_p4 = scmp.lt.s32.totalorder %s20_s13, %s20_s13 }
   0xc   :  { %p425_p3 = scmp.ne.s32.totalorder %s20_s13, %s424_s23  ;;  %p430_p5 = scmp.lt.s32.totalorder %s424_s23, %s424_s23 }
   0xe   :  { %p431_p6 = por %p430_p5, %p429_p4 }
  0x10   :  { %p432_p7 = pnand %p431_p6, %p425_p3 }
  0x12   :  { %435 = shalt.err (!%p432_p7)
}
  0x13   :  { %22 = dma.hbm_to_vmem [thread:$0]  %s594_s0, 128, %s20_s13, [#allocation3]  }
  0x14   :  { %s436_s28 = scalar_lea.hbm %s595_s1, 2048 }
  0x15   :  { %p437_p8 = scmp.ne.s32.totalorder %s595_s1, %s436_s28  ;;  %p440_p9 = scmp.lt.u32.totalorder %s436_s28, %s595_s1 }
  0x17   :  { %p442_p10 = pnand %p440_p9, %p437_p8 }
  0x19   :  { %445 = shalt.err (!%p442_p10)
}
  0x1a   :  { %s446_s6 = scalar_lea.vmem %s539_s15, 2048  ;;  %p451_p12 = scmp.lt.s32.totalorder %s539_s15, %s539_s15 }
  0x1b   :  { %p447_p11 = scmp.ne.s32.totalorder %s539_s15, %s446_s6  ;;  %p452_p13 = scmp.lt.s32.totalorder %s446_s6, %s446_s6 }
  0x1d   :  { %p453_p0 = por %p452_p13, %p451_p12 }
  0x1f   :  { %p454_p1 = pnand %p453_p0, %p447_p11 }
  0x21   :  { %457 = shalt.err (!%p454_p1)
}
  0x22   :  { %s512_s0 = smov 128   ;;  %s513_s7 = smov 8  }
  0x23   :  { %34 = dma.hbm_to_vmem [thread:$0]  %s595_s1, 2048, %s539_s15, [#allocation6], %s512_s0, %s512_s0, %s513_s7  }
  0x24   :  { %502 = dma.done.wait [#allocation3], 128  }
  0x25   :  { %503 = vsyncadd [#allocation3], 4294967168 }
  0x26   :  { %504 = dma.done.wait [#allocation6], 2048  }
  0x27   :  { %505 = vsyncadd [#allocation6], 4294965248  ;;  %v514_v0 = vmov 0.0|0.0   ;;  %vm515_vm0 = vmmov 0   ;;  %v516_v1 = vmov 0.0   ;;  %v42_v2 = vld [vmem:[#allocation5] sm:$0xff]  ;;  %v128_v27 = vlaneseq }
  0x28   :  { %353 = vmatprep.subr.bf16.mxu0 %v514_v0  ;;  %315 = vmatprep.mubr.msk.f32.mxu0 %vm515_vm0, %v516_v1  ;;  %v43_v3 = vld [vmem:[#allocation5 + $0x8] sm:$0xff]  ;;  %v44_v5 = vld [vmem:[#allocation5 + $0x10] sm:$0xff]  ;;  %v45_v6 = vld [vmem:[#allocation5 + $0x18] sm:$0xff]  ;;  %s517_s1 = smov [#allocation8]  }
  0x29   :  { %377 = vmatprep.subr.bf16.mxu1 %v514_v0  ;;  %350 = vmatprep.mubr.msk.f32.mxu1 %vm515_vm0, %v516_v1  ;;  %v354_v4 = vpack.c.bf16 %v43_v3, %v42_v2  ;;  %v357_v7 = vpack.c.bf16 %v45_v6, %v44_v5  ;;  %v46_v8 = vld [vmem:[#allocation5 + $0x20] sm:$0xff]  ;;  %v47_v9 = vld [vmem:[#allocation5 + $0x28] sm:$0xff]  ;;  %v48_v11 = vld [vmem:[#allocation5 + $0x30] sm:$0xff]  ;;  %v129_v28 = vand.u32 127, %v128_v27  ;;  %s235_s10 = sshll.u32 %s517_s1, 4  ;;  %s236_s10 = int_to_ptr.vmem [resolvable:$true] %s235_s10 }
  0x2a   :  { %v360_v10 = vpack.c.bf16 %v47_v9, %v46_v8  ;;  %v49_v12 = vld [vmem:[#allocation5 + $0x38] sm:$0xff]  ;;  %v50_v14 = vld [vmem:[#allocation5 + $0x40] sm:$0xff]  ;;  %v51_v15 = vld [vmem:[#allocation5 + $0x48] sm:$0xff]  ;;  %s458_s11 = scalar_lea.vmem %s236_s10, 128  ;;  %p463_p3 = scmp.lt.s32.totalorder %s236_s10, %s236_s10 }
  0x2b   :  { %355 = vmatpush3.bf16.xpose.msra.mxu0 %v354_v4  ;;  %379 = vmatpush3.bf16.msra.mxu1 %v354_v4  ;;  %v363_v13 = vpack.c.bf16 %v49_v12, %v48_v11  ;;  %v366_v16 = vpack.c.bf16 %v51_v15, %v50_v14  ;;  %v52_v17 = vld [vmem:[#allocation5 + $0x50] sm:$0xff]  ;;  %v53_v18 = vld [vmem:[#allocation5 + $0x58] sm:$0xff]  ;;  %v54_v20 = vld [vmem:[#allocation5 + $0x60] sm:$0xff]  ;;  %vm130_vm1 = vcmp.lt.s32.totalorder %v129_v28, 100  ;;  %p459_p2 = scmp.ne.s32.totalorder %s236_s10, %s458_s11  ;;  %p464_p4 = scmp.lt.s32.totalorder %s458_s11, %s458_s11 }
  0x2c   :  { %356 = vmatprep.subr.bf16.mxu0 %v514_v0  ;;  %380 = vmatprep.subr.bf16.mxu1 %v514_v0  ;;  %v369_v19 = vpack.c.bf16 %v53_v18, %v52_v17  ;;  %v55_v21 = vld [vmem:[#allocation5 + $0x68] sm:$0xff]  ;;  %v56_v23 = vld [vmem:[#allocation5 + $0x70] sm:$0xff]  ;;  %v57_v24 = vld [vmem:[#allocation5 + $0x78] sm:$0xff] }
  0x2d   :  { %v372_v22 = vpack.c.bf16 %v55_v21, %v54_v20  ;;  %v375_v25 = vpack.c.bf16 %v57_v24, %v56_v23  ;;  %v41_v26 = vld [vmem:[#allocation2] sm:$0xff]  ;;  %p465_p5 = por %p464_p4, %p463_p3 }
  0x2f   :  { %382 = vmatpush3.bf16.msra.mxu1 %v357_v7  ;;  %p466_p6 = pnand %p465_p5, %p459_p2 }
  0x30   :  { %383 = vmatprep.subr.bf16.mxu1 %v514_v0 }
  0x33   :  { %358 = vmatpush3.bf16.xpose.msra.mxu0 %v357_v7  ;;  %385 = vmatpush3.bf16.msra.mxu1 %v360_v10 }
  0x34   :  { %359 = vmatprep.subr.bf16.mxu0 %v514_v0  ;;  %386 = vmatprep.subr.bf16.mxu1 %v514_v0 }
  0x37   :  { %388 = vmatpush3.bf16.msra.mxu1 %v363_v13 }
  0x38   :  { %389 = vmatprep.subr.bf16.mxu1 %v514_v0 }
  0x3b   :  { %361 = vmatpush3.bf16.xpose.msra.mxu0 %v360_v10  ;;  %391 = vmatpush3.bf16.msra.mxu1 %v366_v16 }
  0x3c   :  { %362 = vmatprep.subr.bf16.mxu0 %v514_v0  ;;  %392 = vmatprep.subr.bf16.mxu1 %v514_v0 }
  0x3f   :  { %394 = vmatpush3.bf16.msra.mxu1 %v369_v19 }
  0x40   :  { %395 = vmatprep.subr.bf16.mxu1 %v514_v0 }
  0x43   :  { %364 = vmatpush3.bf16.xpose.msra.mxu0 %v363_v13  ;;  %397 = vmatpush3.bf16.msra.mxu1 %v372_v22 }
  0x44   :  { %365 = vmatprep.subr.bf16.mxu0 %v514_v0  ;;  %398 = vmatprep.subr.bf16.mxu1 %v514_v0 }
  0x47   :  { %400 = vmatpush3.bf16.msra.mxu1 %v375_v25 }
  0x4b   :  { %367 = vmatpush3.bf16.xpose.msra.mxu0 %v366_v16 }
  0x4c   :  { %368 = vmatprep.subr.bf16.mxu0 %v514_v0 }
  0x53   :  { %370 = vmatpush3.bf16.xpose.msra.mxu0 %v369_v19 }
  0x54   :  { %371 = vmatprep.subr.bf16.mxu0 %v514_v0 }
  0x5b   :  { %373 = vmatpush3.bf16.xpose.msra.mxu0 %v372_v22 }
  0x5c   :  { %374 = vmatprep.subr.bf16.mxu0 %v514_v0 }
  0x63   :  { %376 = vmatpush3.bf16.xpose.msra.mxu0 %v375_v25 }
  0x6a   :  { %316 = vmatmul.mubr.f32.vlgmr.msra.gmra.mrb[0].mxu0 %v41_v26 }
 0x13d   :  { %v124_v29 = vpop.f32.mrb[0].mxu0 }
 0x13e   :  { %v317_v30 = vpop.f32.mrb[1].mxu0  ;;  %v131_v31 = vsel %vm130_vm1, %v124_v29, -1e+30 }
 0x13f   :  { %132 = vmax.xlane.f32.xlu0 %v131_v31 }
 0x1cc   :  { %v133_v32 = vpop.xlane.xlu0 %132 }
 0x1cd   :  { %v134_v33 = vsub.f32 %v131_v31, %v133_v32 }
 0x1cf   :  { %v135_v34 = vmul.f32 1.442695, %v134_v33 }
 0x1d1   :  { %410 = vpow2.f32 %v135_v34 }
 0x1db   :  { %v411_v35 = vpop.eup %410 }
 0x1dc   :  { %137 = vadd.xlane.f32.xlu0 %v411_v35 }
 0x269   :  { %v138_v36 = vpop.xlane.xlu0 %137 }
 0x26a   :  { %v139_v37 = vmul.f32 0.0025, %v138_v36 }
 0x26c   :  { %vm140_vm2 = vcmp.gt.f32.partialorder %v411_v35, %v139_v37 }
 0x26d   :  { %v141_v38 = vsel %vm140_vm2, %v411_v35, 0.0 }
 0x26e   :  { %142 = vadd.xlane.f32.xlu1 %v141_v38 }
 0x2fb   :  { %v143_v39 = vpop.xlane.xlu1 %142 }
 0x2fc   :  { %v144_v40 = vmax.f32 %v143_v39, 1e-12 }
 0x2fe   :  { %412 = vrcp.f32 %v144_v40 }
 0x308   :  { %v413_v41 = vpop.eup %412 }
 0x309   :  { %v146_v42 = vmul.f32 %v413_v41, %v141_v38 }
 0x30b   :  { %351 = vmatmul.mubr.f32.vlgmr.msra.gmra.mrb[0].mxu1 %v146_v42  ;;  %218 = vst [vmem:[#allocation8] sm:$0xff] %v146_v42 }
 0x30c   :  { %469 = shalt.err (!%p466_p6)
}
 0x30d   :  { %s470_s14 = scalar_lea.hbm %s597_s3, 128 }
 0x30e   :  { %p471_p7 = scmp.ne.s32.totalorder %s597_s3, %s470_s14  ;;  %p474_p8 = scmp.lt.u32.totalorder %s470_s14, %s597_s3 }
 0x310   :  { %p476_p9 = pnand %p474_p8, %p471_p7 }
 0x312   :  { %479 = shalt.err (!%p476_p9)
}
 0x313   :  { %238 = dma.vmem_to_hbm [thread:$0]  %s236_s10, 128, %s597_s3, [#allocation9]  }
 0x314   :  { %s518_s21 = smov [#allocation7]  }
 0x315   :  { %s225_s22 = sshll.u32 %s518_s21, 4  ;;  %s226_s22 = int_to_ptr.vmem [resolvable:$true] %s225_s22 }
 0x316   :  { %s480_s23 = scalar_lea.vmem %s226_s22, 128  ;;  %p485_p11 = scmp.lt.s32.totalorder %s226_s22, %s226_s22 }
 0x317   :  { %p481_p10 = scmp.ne.s32.totalorder %s226_s22, %s480_s23  ;;  %p486_p12 = scmp.lt.s32.totalorder %s480_s23, %s480_s23 }
 0x319   :  { %p487_p13 = por %p486_p12, %p485_p11 }
 0x31b   :  { %p488_p0 = pnand %p487_p13, %p481_p10 }
 0x3de   :  { %v213_v43 = vpop.f32.mrb[0].mxu1 }
 0x3df   :  { %217 = vst [vmem:[#allocation7] sm:$0xff] %v213_v43  ;;  %v352_v44 = vpop.f32.mrb[1].mxu1 }
 0x3e0   :  { %491 = shalt.err (!%p488_p0)
}
 0x3e1   :  { %s492_s26 = scalar_lea.hbm %s596_s2, 128 }
 0x3e2   :  { %p493_p1 = scmp.ne.s32.totalorder %s596_s2, %s492_s26  ;;  %p496_p2 = scmp.lt.u32.totalorder %s492_s26, %s596_s2 }
 0x3e4   :  { %p498_p3 = pnand %p496_p2, %p493_p1 }
 0x3e6   :  { %501 = shalt.err (!%p498_p3)
}
 0x3e7   :  { %228 = dma.vmem_to_hbm [thread:$0]  %s226_s22, 128, %s596_s2, [#allocation4]  }
 0x3e8   :  { %506 = dma.done.wait [#allocation4], 128  }
 0x3e9   :  { %507 = vsyncadd [#allocation4], 4294967168 }
 0x3ea   :  { %508 = dma.done.wait [#allocation9], 128  }
 0x3eb   :  { %509 = vsyncadd [#allocation9], 4294967168 }
 0x3ec   :  { %245 = vsyncpa [#allocation3], 1 }
 0x3ed   :  { %246 = vsyncpa [#allocation6], 1 }
 0x3ee   :  { %247 = vsyncpa [#allocation4], 1 }
 0x3ef   :  { %248 = vsyncpa [#allocation9], 1 }

</bundles_post_ra>
